<compile_context>
chip_gen: v7x
topology: tpu7x:2x2x1
jax: 0.10.0
libtpu: 0.0.40
codegen_flags: <defaults>
</compile_context>

<pallas_src>
import jax
import jax.numpy as jnp
from jax.experimental import pallas as pl
from jax.experimental.pallas import tpu as pltpu


def _cdiv(a, b):
    return -(-a // b)


# ---------------------------------------------------------------------------
# Pallas kernel: fused stacked-K conv (+ folded BN bias) (+ shortcut) (+ ReLU)
# ---------------------------------------------------------------------------
def _make_conv_kernel(tap_offsets, tmo, cin, mode, apply_relu, use_mask, stacked):
    """mode: 'plain' | 'identity' (direct residual add) | 'proj' (fused 1x1)."""

    def kernel(*refs):
        it = iter(refs)
        xm_ref = next(it)          # (Cin, tmo)     main activation window (bf16)
        xh_ref = next(it)          # (Cin, halo)    right halo window (bf16)
        w_ref = next(it)           # (Cout, 9*Cin)  folded conv weights (bf16)
        b_ref = next(it)           # (Cout, 1)      folded BN bias (f32)
        m_ref = next(it) if use_mask else None      # (1, tmo) validity mask
        if mode == "identity":
            r_ref = next(it)       # (Cout, tmo)    identity shortcut (bf16)
        elif mode == "proj":
            s_ref = next(it)       # (Cs, tmo)      shortcut activation (bf16)
            sw_ref = next(it)      # (Cout, Cs)     folded 1x1 weights (bf16)
            sb_ref = next(it)      # (Cout, 1)      folded shortcut BN bias (f32)
        o_ref = next(it)           # (Cout, tmo)

        # Activation slab = main tile + right halo (both already in VMEM).
        slab = jnp.concatenate([xm_ref[...], xh_ref[...]], axis=-1)

        if stacked:
            # Stack the 9 shifted tap windows along the contraction dim and do
            # ONE MXU matmul with K = 9*Cin (instead of 9 matmuls with K=Cin).
            xk = jnp.concatenate(
                [slab[:, off:off + tmo] for off in tap_offsets], axis=0)
            acc = jnp.dot(w_ref[...], xk, preferred_element_type=jnp.float32)
        else:
            # Cin already >= MXU depth: per-tap matmuls (bounded operand size).
            acc = jnp.zeros(o_ref.shape, jnp.float32)
            for t, off in enumerate(tap_offsets):
                acc = acc + jnp.dot(
                    w_ref[:, t * cin:(t + 1) * cin], slab[:, off:off + tmo],
                    preferred_element_type=jnp.float32)

        out = acc + b_ref[...]                            # folded BN bias
        if mode == "identity":
            out = out + r_ref[...].astype(jnp.float32)    # identity shortcut
        elif mode == "proj":                              # fused 1x1 conv + BN
            out = out + jnp.dot(sw_ref[...], s_ref[...],
                                preferred_element_type=jnp.float32) + sb_ref[...]
        if apply_relu:
            out = jnp.maximum(out, 0.0)
        if use_mask:
            out = out * m_ref[...]                        # zero spatial-pad lanes
        o_ref[...] = out.astype(o_ref.dtype)

    return kernel


def tap_conv_flat(x_flat, w_stack, bias, wp, ksize, *, mo=None, apply_relu,
                  out_dtype, mask=None, residual=None, proj=None,
                  max_lane_tile=1024):
    """Fused conv(+BN bias)(+shortcut)(+ReLU) on a channel-first, spatially
    padded, flattened activation.

    x_flat  : (Cin, L)  flat activation over the padded grid (N, Hp, Wp);
              lanes beyond the real data (if any) must be zero.
    w_stack : (Cout, 9*Cin) bf16, BN scale folded in, tap-major column order.
    bias    : (Cout, 1) f32 folded BN bias.
    wp      : padded image width (lane stride of one row in the flat layout).
    mo      : number of meaningful output lanes (defaults to L).
    mask    : optional (1, <=mo_pad) validity mask multiplied into the output.
    residual: optional (Cout, <=mo_pad) added before the ReLU (identity path).
    proj    : optional (s_flat (Cs, <=mo_pad), sw (Cout, Cs) bf16, sb (Cout,1))
              fused 1x1 projection shortcut.
    Returns (out (Cout, mo_pad) in out_dtype, mo_pad).  Lanes at spatial-pad
    positions are either zero (mask given) or garbage to be sliced off.
    """
    cin, xlen = x_flat.shape
    if mo is None:
        mo = xlen
    cout, kcin = w_stack.shape
    n_taps = ksize * ksize
    assert kcin == n_taps * cin
    pad = (ksize - 1) // 2
    max_off = (ksize - 1) * wp + (ksize - 1)
    halo = 128 * _cdiv(max_off, 128)

    # Lane tile: multiple of 128 (and of `halo` so the halo BlockSpec block
    # index is exact), capped, and sized so the grid keeps >= 2 steps whenever
    # possible (v7x shards the "parallel" grid across its 2 TensorCores).
    assert max_lane_tile >= 128
    tmo = 128 * min(max_lane_tile // 128, max(1, _cdiv(mo, 2 * 128)))
    tmo = halo * _cdiv(tmo, halo)
    grid = _cdiv(mo, tmo)
    mo_pad = grid * tmo
    length = mo_pad + halo
    left = pad * wp + pad          # tap (dy,dx) of lane m reads lane m+dy*wp+dx

    xbf = x_flat.astype(jnp.bfloat16)
    avail = length - left
    if xlen > avail:
        xbf = xbf[:, :avail]       # trailing lanes are zero-padding anyway
    x_ext = jnp.pad(xbf, ((0, 0), (left, avail - min(xlen, avail))))

    tap_offsets = tuple(dy * wp + dx for dy in range(ksize) for dx in range(ksize))
    hstep = tmo // halo

    inputs = [x_ext, x_ext, w_stack, bias]
    in_specs = [
        pl.BlockSpec((cin, tmo), lambda i: (0, i)),                    # main tile
        pl.BlockSpec((cin, halo), lambda i: (0, i * hstep + hstep)),   # right halo
        pl.BlockSpec((cout, kcin), lambda i: (0, 0)),                  # weights
        pl.BlockSpec((cout, 1), lambda i: (0, 0)),                     # BN bias
    ]

    use_mask = mask is not None
    if use_mask:
        m = mask.astype(jnp.float32)
        if m.shape[1] != mo_pad:
            m = jnp.pad(m, ((0, 0), (0, mo_pad - m.shape[1])))
        inputs.append(m)
        in_specs.append(pl.BlockSpec((1, tmo), lambda i: (0, i)))

    mode = "plain"
    if residual is not None:
        mode = "identity"
        r = residual.astype(jnp.bfloat16)
        if r.shape[1] != mo_pad:
            r = jnp.pad(r, ((0, 0), (0, mo_pad - r.shape[1])))
        inputs.append(r)
        in_specs.append(pl.BlockSpec((cout, tmo), lambda i: (0, i)))
    elif proj is not None:
        mode = "proj"
        s_flat, sw, sb = proj
        cs = s_flat.shape[0]
        s = s_flat.astype(jnp.bfloat16)
        if s.shape[1] != mo_pad:
            s = jnp.pad(s, ((0, 0), (0, mo_pad - s.shape[1])))
        inputs += [s, sw, sb]
        in_specs += [
            pl.BlockSpec((cs, tmo), lambda i: (0, i)),
            pl.BlockSpec((cout, cs), lambda i: (0, 0)),
            pl.BlockSpec((cout, 1), lambda i: (0, 0)),
        ]

    stacked = cin < 128   # per review: single stacked-K dot below MXU depth
    kernel = _make_conv_kernel(tap_offsets, tmo, cin, mode, apply_relu,
                               use_mask, stacked)
    out = pl.pallas_call(
        kernel,
        out_shape=jax.ShapeDtypeStruct((cout, mo_pad), out_dtype),
        grid_spec=pltpu.PrefetchScalarGridSpec(
            num_scalar_prefetch=0,
            grid=(grid,),
            in_specs=in_specs,
            out_specs=pl.BlockSpec((cout, tmo), lambda i: (0, i)),
        ),
        compiler_params=pltpu.CompilerParams(
            dimension_semantics=("parallel",)),
    )(*inputs)
    return out, mo_pad


# ---------------------------------------------------------------------------
# Glue: BN folding, weight prep, parameter init, block forward
# ---------------------------------------------------------------------------
def fold_bn(gamma, beta, mean, var, eps=1e-5):
    scale = gamma / jnp.sqrt(var + eps)
    bias = beta - mean * scale
    return scale, bias


def _prep_conv_weights(w_hwio, scale):
    """(kh,kw,Cin,Cout) HWIO -> (Cout, kh*kw*Cin) bf16, BN scale folded in.

    Column order is tap-major (dy, dx row-major), Cin-minor — matching the
    in-kernel stacked-K operand built from the 9 shifted activation windows.
    """
    kh, kw, cin, cout = w_hwio.shape
    wf = w_hwio * scale[None, None, None, :]
    wf = jnp.transpose(wf, (3, 0, 1, 2)).reshape(cout, kh * kw * cin)
    return wf.astype(jnp.bfloat16)


def init_basic_block_params(key, in_planes, planes, stride):
    keys = jax.random.split(key, 16)

    def conv_w(k, kh, kw, cin, cout):
        bound = 1.0 / jnp.sqrt(kh * kw * cin)
        return jax.random.uniform(k, (kh, kw, cin, cout), jnp.float32,
                                  -bound, bound)

    def bn_params(k0, k1, k2, k3, c):
        gamma = jax.random.uniform(k0, (c,), jnp.float32, 0.5, 1.5)
        beta = jax.random.uniform(k1, (c,), jnp.float32, -0.5, 0.5)
        mean = jax.random.uniform(k2, (c,), jnp.float32, -0.1, 0.1)
        var = jax.random.uniform(k3, (c,), jnp.float32, 0.5, 1.5)
        return (gamma, beta, mean, var)

    params = {
        "w1": conv_w(keys[0], 3, 3, in_planes, planes),
        "bn1": bn_params(keys[1], keys[2], keys[3], keys[4], planes),
        "w2": conv_w(keys[5], 3, 3, planes, planes),
        "bn2": bn_params(keys[6], keys[7], keys[8], keys[9], planes),
    }
    if stride != 1 or in_planes != planes:
        params["ws"] = conv_w(keys[10], 1, 1, in_planes, planes)
        params["bns"] = bn_params(keys[11], keys[12], keys[13], keys[14], planes)
    return params


def basic_block_forward(x_nchw, params, stride):
    x = jnp.transpose(x_nchw, (1, 0, 2, 3)).astype(jnp.float32)   # (Cin, N, H, W)
    cin, n, h, w = x.shape
    planes = params["w1"].shape[-1]

    s1, b1 = fold_bn(*params["bn1"])
    w1s = _prep_conv_weights(params["w1"], s1)
    b1f = b1.reshape(planes, 1).astype(jnp.float32)

    hp1, wp1 = h + 2, w + 2
    mo1 = n * hp1 * wp1
    x_pad = jnp.pad(x, ((0, 0), (0, 0), (1, 1), (1, 1)))
    x1_flat = x_pad.reshape(cin, mo1)

    # ---- conv1 + bn1 + relu (one fused kernel) -----------------------------
    if stride == 1:
        # In-kernel validity mask zeroes spatial-pad lanes so conv1's bf16
        # output is directly a valid zero-padded flat input for conv2: no
        # reshape/slice/re-pad round-trip between the two convs.
        mask1 = jnp.pad(jnp.ones((n, h, w), jnp.float32),
                        ((0, 0), (1, 1), (1, 1))).reshape(1, mo1)
        a2, _ = tap_conv_flat(x1_flat, w1s, b1f, wp1, 3, apply_relu=True,
                              out_dtype=jnp.bfloat16, mask=mask1)
        ho, wo = h, w
        hp2, wp2, mo2 = hp1, wp1, mo1
    else:
        # TODO(synk): phase-decompose the stride-2 conv instead of computing
        # stride-1 output and subsampling on the host (4x wasted work).
        out1, _ = tap_conv_flat(x1_flat, w1s, b1f, wp1, 3, apply_relu=True,
                                out_dtype=jnp.bfloat16)
        out1 = out1[:, :mo1].reshape(planes, n, hp1, wp1)
        out1 = out1[:, :, 1:1 + h:stride, 1:1 + w:stride]
        ho, wo = out1.shape[2], out1.shape[3]
        hp2, wp2 = ho + 2, wo + 2
        mo2 = n * hp2 * wp2
        a2 = jnp.pad(out1, ((0, 0), (0, 0), (1, 1), (1, 1))).reshape(planes, mo2)

    # ---- conv2 + bn2 + shortcut + relu (one fused kernel) ------------------
    s2, b2 = fold_bn(*params["bn2"])
    w2s = _prep_conv_weights(params["w2"], s2)
    b2f = b2.reshape(planes, 1).astype(jnp.float32)

    if "ws" in params:
        # Projection shortcut: 1x1 strided conv + BN, fused into conv2's kernel.
        ss, bs = fold_bn(*params["bns"])
        swt = (params["ws"].reshape(cin, planes) * ss[None, :]).T.astype(jnp.bfloat16)
        sbf = bs.reshape(planes, 1).astype(jnp.float32)
        xs = x if stride == 1 else x[:, :, ::stride, ::stride]
        s_flat = jnp.pad(xs, ((0, 0), (0, 0), (1, 1), (1, 1))).reshape(cin, mo2)
        out2, _ = tap_conv_flat(a2, w2s, b2f, wp2, 3, mo=mo2, apply_relu=True,
                                out_dtype=jnp.float32, proj=(s_flat, swt, sbf))
    else:
        # Identity shortcut (stride == 1, in_planes == planes): added in-kernel.
        r_flat = x_pad.reshape(planes, mo2)
        out2, _ = tap_conv_flat(a2, w2s, b2f, wp2, 3, mo=mo2, apply_relu=True,
                                out_dtype=jnp.float32, residual=r_flat)

    out2 = out2[:, :mo2].reshape(planes, n, hp2, wp2)[:, :, 1:1 + ho, 1:1 + wo]
    return jnp.transpose(out2, (1, 0, 2, 3))   # back to NCHW


# ---------------------------------------------------------------------------
# Pure-JAX reference (for correctness check)
# ---------------------------------------------------------------------------
def ref_basic_block(x_nchw, params, stride):
    x = jnp.transpose(x_nchw, (0, 2, 3, 1)).astype(jnp.float32)

    def conv(x, w, stride, pad):
        return jax.lax.conv_general_dilated(
            x, w, (stride, stride), [(pad, pad), (pad, pad)],
            dimension_numbers=("NHWC", "HWIO", "NHWC"))

    def bn(x, p, eps=1e-5):
        g, b, m, v = p
        return (x - m) / jnp.sqrt(v + eps) * g + b

    out = jax.nn.relu(bn(conv(x, params["w1"], stride, 1), params["bn1"]))
    out = bn(conv(out, params["w2"], 1, 1), params["bn2"])
    if "ws" in params:
        sc = bn(conv(x, params["ws"], stride, 0), params["bns"])
    else:
        sc = x
    out = jax.nn.relu(out + sc)
    return jnp.transpose(out, (0, 3, 1, 2))


# ---------------------------------------------------------------------------
if __name__ == "__main__":
    key = jax.random.PRNGKey(0)
    kx, kp1, kp2 = jax.random.split(key, 3)

    # PyTorch-style NCHW input: batch=2, channels=4, spatial=16x16
    x = jax.random.normal(kx, (2, 4, 16, 16), jnp.float32)

    # bf16 MXU operands / bf16 intermediates (f32 accumulation) -> loosened tol.
    ATOL = RTOL = 6e-2

    fwd = jax.jit(basic_block_forward, static_argnums=(2,))

    # Case 1: projection shortcut (stride=2, channel expansion 4 -> 8)
    params_proj = init_basic_block_params(kp1, in_planes=4, planes=8, stride=2)
    out_proj = fwd(x, params_proj, 2)
    jax.block_until_ready(out_proj)
    ref_proj = ref_basic_block(x, params_proj, 2)
    assert out_proj.shape == (2, 8, 8, 8)
    assert jnp.allclose(out_proj, ref_proj, atol=ATOL, rtol=RTOL)

    # Case 2: identity shortcut (stride=1, in_planes == planes)
    params_id = init_basic_block_params(kp2, in_planes=4, planes=4, stride=1)
    out_id = fwd(x, params_id, 1)
    jax.block_until_ready(out_id)
    ref_id = ref_basic_block(x, params_id, 1)
    assert out_id.shape == (2, 4, 16, 16)
    assert jnp.allclose(out_id, ref_id, atol=ATOL, rtol=RTOL)

    print("KERNEL_OK")
</pallas_src>

<mosaic_0001>
module attributes {stable_mosaic.version = 11 : i64} {
  func.func @kernel(%arg0: i32, %arg1: memref<4x384xbf16, #tpu.memory_space<vmem>>, %arg2: memref<4x128xbf16, #tpu.memory_space<vmem>>, %arg3: memref<8x36xbf16, #tpu.memory_space<vmem>>, %arg4: memref<8x1xf32, #tpu.memory_space<vmem>>, %arg5: memref<8x384xbf16, #tpu.memory_space<vmem>>) attributes {dimension_semantics = [#tpu.dimension_semantics<parallel>], iteration_bounds = array<i64: 2>, scalar_prefetch = 0 : i64, scratch_operands = 0 : i64, tpu.core_type = #tpu.core_type<tc>, window_params = [{transform_indices = @transform_0, window_bounds = array<i64: 4, 384>}, {transform_indices = @transform_1, window_bounds = array<i64: 4, 128>}, {pipeline_mode = #tpu.pipeline_mode<synchronous>, transform_indices = @transform_2, window_bounds = array<i64: 8, 36>}, {pipeline_mode = #tpu.pipeline_mode<synchronous>, transform_indices = @transform_3, window_bounds = array<i64: 8, 1>}, {transform_indices = @transform_4, window_bounds = array<i64: 8, 384>}]} {
    %c0 = arith.constant 0 : index
    %c0_0 = arith.constant 0 : index
    %0 = vector.load %arg1[%c0, %c0_0] : memref<4x384xbf16, #tpu.memory_space<vmem>>, vector<4x384xbf16>
    %c0_1 = arith.constant 0 : index
    %c0_2 = arith.constant 0 : index
    %1 = vector.load %arg2[%c0_1, %c0_2] : memref<4x128xbf16, #tpu.memory_space<vmem>>, vector<4x128xbf16>
    %2 = tpu.concatenate %0, %1 in 1 : vector<4x384xbf16>, vector<4x128xbf16> -> vector<4x512xbf16>
    %3 = vector.extract_strided_slice %2 {offsets = [0, 0], sizes = [4, 384], strides = [1, 1]} : vector<4x512xbf16> to vector<4x384xbf16>
    %4 = vector.extract_strided_slice %2 {offsets = [0, 1], sizes = [4, 384], strides = [1, 1]} : vector<4x512xbf16> to vector<4x384xbf16>
    %5 = vector.extract_strided_slice %2 {offsets = [0, 2], sizes = [4, 384], strides = [1, 1]} : vector<4x512xbf16> to vector<4x384xbf16>
    %6 = vector.extract_strided_slice %2 {offsets = [0, 18], sizes = [4, 384], strides = [1, 1]} : vector<4x512xbf16> to vector<4x384xbf16>
    %7 = vector.extract_strided_slice %2 {offsets = [0, 19], sizes = [4, 384], strides = [1, 1]} : vector<4x512xbf16> to vector<4x384xbf16>
    %8 = vector.extract_strided_slice %2 {offsets = [0, 20], sizes = [4, 384], strides = [1, 1]} : vector<4x512xbf16> to vector<4x384xbf16>
    %9 = vector.extract_strided_slice %2 {offsets = [0, 36], sizes = [4, 384], strides = [1, 1]} : vector<4x512xbf16> to vector<4x384xbf16>
    %10 = vector.extract_strided_slice %2 {offsets = [0, 37], sizes = [4, 384], strides = [1, 1]} : vector<4x512xbf16> to vector<4x384xbf16>
    %11 = vector.extract_strided_slice %2 {offsets = [0, 38], sizes = [4, 384], strides = [1, 1]} : vector<4x512xbf16> to vector<4x384xbf16>
    %12 = tpu.concatenate %3, %4, %5, %6, %7, %8, %9, %10, %11 in 0 : vector<4x384xbf16>, vector<4x384xbf16>, vector<4x384xbf16>, vector<4x384xbf16>, vector<4x384xbf16>, vector<4x384xbf16>, vector<4x384xbf16>, vector<4x384xbf16>, vector<4x384xbf16> -> vector<36x384xbf16>
    %c0_3 = arith.constant 0 : index
    %c0_4 = arith.constant 0 : index
    %13 = vector.load %arg3[%c0_3, %c0_4] : memref<8x36xbf16, #tpu.memory_space<vmem>>, vector<8x36xbf16>
    %cst = arith.constant dense<0.000000e+00> : vector<8x384xf32>
    %14 = tpu.matmul %13, %12, %cst {dimension_numbers = #tpu.dot_dimension_numbers<[1], [0], [0], [1], [0, 0, 1, 1], [], []>} : vector<8x36xbf16>, vector<36x384xbf16>, vector<8x384xf32> -> vector<8x384xf32>
    %c0_5 = arith.constant 0 : index
    %c0_6 = arith.constant 0 : index
    %15 = vector.load %arg4[%c0_5, %c0_6] : memref<8x1xf32, #tpu.memory_space<vmem>>, vector<8x1xf32>
    %16 = vector.broadcast %15 : vector<8x1xf32> to vector<8x384xf32>
    %17 = arith.addf %14, %16 : vector<8x384xf32>
    %cst_7 = arith.constant 0.000000e+00 : f32
    %18 = vector.broadcast %cst_7 : f32 to vector<8x384xf32>
    %19 = arith.maximumf %17, %18 : vector<8x384xf32>
    %20 = arith.truncf %19 : vector<8x384xf32> to vector<8x384xbf16>
    %c0_8 = arith.constant 0 : index
    %c0_9 = arith.constant 0 : index
    %21 = vector.load %arg5[%c0_8, %c0_9] : memref<8x384xbf16, #tpu.memory_space<vmem>>, vector<8x384xbf16>
    tpu.vector_store %arg5[%c0_8, %c0_9], %20 {strides = array<i32>} : memref<8x384xbf16, #tpu.memory_space<vmem>>, vector<8x384xbf16>,
    return
  }
  func.func @transform_0(%arg0: i32) -> (i32, i32) {
    %c0_i32 = arith.constant 0 : i32
    %c0_i32_0 = arith.constant 0 : i32
    return %c0_i32, %arg0 : i32, i32
  }
  func.func @transform_1(%arg0: i32) -> (i32, i32) {
    %c3_i32 = arith.constant 3 : i32
    %0 = arith.muli %arg0, %c3_i32 : i32
    %c3_i32_0 = arith.constant 3 : i32
    %1 = arith.addi %0, %c3_i32_0 : i32
    %c0_i32 = arith.constant 0 : i32
    %c0_i32_1 = arith.constant 0 : i32
    return %c0_i32, %1 : i32, i32
  }
  func.func @transform_2(%arg0: i32) -> (i32, i32) {
    %c0_i32 = arith.constant 0 : i32
    %c0_i32_0 = arith.constant 0 : i32
    %c0_i32_1 = arith.constant 0 : i32
    return %c0_i32, %c0_i32_0 : i32, i32
  }
  func.func @transform_3(%arg0: i32) -> (i32, i32) {
    %c0_i32 = arith.constant 0 : i32
    %c0_i32_0 = arith.constant 0 : i32
    %c0_i32_1 = arith.constant 0 : i32
    return %c0_i32, %c0_i32_0 : i32, i32
  }
  func.func @transform_4(%arg0: i32) -> (i32, i32) {
    %c0_i32 = arith.constant 0 : i32
    %c0_i32_0 = arith.constant 0 : i32
    return %c0_i32, %arg0 : i32, i32
  }
}

module attributes {stable_mosaic.version = 11 : i64} {
  func.func @kernel(%arg0: i32, %arg1: memref<8x128xbf16, #tpu.memory_space<vmem>>, %arg2: memref<8x128xbf16, #tpu.memory_space<vmem>>, %arg3: memref<8x72xbf16, #tpu.memory_space<vmem>>, %arg4: memref<8x1xf32, #tpu.memory_space<vmem>>, %arg5: memref<4x128xbf16, #tpu.memory_space<vmem>>, %arg6: memref<8x4xbf16, #tpu.memory_space<vmem>>, %arg7: memref<8x1xf32, #tpu.memory_space<vmem>>, %arg8: memref<8x128xf32, #tpu.memory_space<vmem>>) attributes {dimension_semantics = [#tpu.dimension_semantics<parallel>], iteration_bounds = array<i64: 2>, scalar_prefetch = 0 : i64, scratch_operands = 0 : i64, tpu.core_type = #tpu.core_type<tc>, window_params = [{transform_indices = @transform_0, window_bounds = array<i64: 8, 128>}, {transform_indices = @transform_1, window_bounds = array<i64: 8, 128>}, {pipeline_mode = #tpu.pipeline_mode<synchronous>, transform_indices = @transform_2, window_bounds = array<i64: 8, 72>}, {pipeline_mode = #tpu.pipeline_mode<synchronous>, transform_indices = @transform_3, window_bounds = array<i64: 8, 1>}, {transform_indices = @transform_4, window_bounds = array<i64: 4, 128>}, {pipeline_mode = #tpu.pipeline_mode<synchronous>, transform_indices = @transform_5, window_bounds = array<i64: 8, 4>}, {pipeline_mode = #tpu.pipeline_mode<synchronous>, transform_indices = @transform_6, window_bounds = array<i64: 8, 1>}, {transform_indices = @transform_7, window_bounds = array<i64: 8, 128>}]} {
    %c0 = arith.constant 0 : index
    %c0_0 = arith.constant 0 : index
    %0 = vector.load %arg1[%c0, %c0_0] : memref<8x128xbf16, #tpu.memory_space<vmem>>, vector<8x128xbf16>
    %c0_1 = arith.constant 0 : index
    %c0_2 = arith.constant 0 : index
    %1 = vector.load %arg2[%c0_1, %c0_2] : memref<8x128xbf16, #tpu.memory_space<vmem>>, vector<8x128xbf16>
    %2 = tpu.concatenate %0, %1 in 1 : vector<8x128xbf16>, vector<8x128xbf16> -> vector<8x256xbf16>
    %3 = vector.extract_strided_slice %2 {offsets = [0, 0], sizes = [8, 128], strides = [1, 1]} : vector<8x256xbf16> to vector<8x128xbf16>
    %4 = vector.extract_strided_slice %2 {offsets = [0, 1], sizes = [8, 128], strides = [1, 1]} : vector<8x256xbf16> to vector<8x128xbf16>
    %5 = vector.extract_strided_slice %2 {offsets = [0, 2], sizes = [8, 128], strides = [1, 1]} : vector<8x256xbf16> to vector<8x128xbf16>
    %6 = vector.extract_strided_slice %2 {offsets = [0, 10], sizes = [8, 128], strides = [1, 1]} : vector<8x256xbf16> to vector<8x128xbf16>
    %7 = vector.extract_strided_slice %2 {offsets = [0, 11], sizes = [8, 128], strides = [1, 1]} : vector<8x256xbf16> to vector<8x128xbf16>
    %8 = vector.extract_strided_slice %2 {offsets = [0, 12], sizes = [8, 128], strides = [1, 1]} : vector<8x256xbf16> to vector<8x128xbf16>
    %9 = vector.extract_strided_slice %2 {offsets = [0, 20], sizes = [8, 128], strides = [1, 1]} : vector<8x256xbf16> to vector<8x128xbf16>
    %10 = vector.extract_strided_slice %2 {offsets = [0, 21], sizes = [8, 128], strides = [1, 1]} : vector<8x256xbf16> to vector<8x128xbf16>
    %11 = vector.extract_strided_slice %2 {offsets = [0, 22], sizes = [8, 128], strides = [1, 1]} : vector<8x256xbf16> to vector<8x128xbf16>
    %12 = tpu.concatenate %3, %4, %5, %6, %7, %8, %9, %10, %11 in 0 : vector<8x128xbf16>, vector<8x128xbf16>, vector<8x128xbf16>, vector<8x128xbf16>, vector<8x128xbf16>, vector<8x128xbf16>, vector<8x128xbf16>, vector<8x128xbf16>, vector<8x128xbf16> -> vector<72x128xbf16>
    %c0_3 = arith.constant 0 : index
    %c0_4 = arith.constant 0 : index
    %13 = vector.load %arg3[%c0_3, %c0_4] : memref<8x72xbf16, #tpu.memory_space<vmem>>, vector<8x72xbf16>
    %cst = arith.constant dense<0.000000e+00> : vector<8x128xf32>
    %14 = tpu.matmul %13, %12, %cst {dimension_numbers = #tpu.dot_dimension_numbers<[1], [0], [0], [1], [0, 0, 1, 1], [], []>} : vector<8x72xbf16>, vector<72x128xbf16>, vector<8x128xf32> -> vector<8x128xf32>
    %c0_5 = arith.constant 0 : index
    %c0_6 = arith.constant 0 : index
    %15 = vector.load %arg4[%c0_5, %c0_6] : memref<8x1xf32, #tpu.memory_space<vmem>>, vector<8x1xf32>
    %16 = vector.broadcast %15 : vector<8x1xf32> to vector<8x128xf32>
    %17 = arith.addf %14, %16 : vector<8x128xf32>
    %c0_7 = arith.constant 0 : index
    %c0_8 = arith.constant 0 : index
    %18 = vector.load %arg6[%c0_7, %c0_8] : memref<8x4xbf16, #tpu.memory_space<vmem>>, vector<8x4xbf16>
    %c0_9 = arith.constant 0 : index
    %c0_10 = arith.constant 0 : index
    %19 = vector.load %arg5[%c0_9, %c0_10] : memref<4x128xbf16, #tpu.memory_space<vmem>>, vector<4x128xbf16>
    %cst_11 = arith.constant dense<0.000000e+00> : vector<8x128xf32>
    %20 = tpu.matmul %18, %19, %cst_11 {dimension_numbers = #tpu.dot_dimension_numbers<[1], [0], [0], [1], [0, 0, 1, 1], [], []>} : vector<8x4xbf16>, vector<4x128xbf16>, vector<8x128xf32> -> vector<8x128xf32>
    %21 = arith.addf %17, %20 : vector<8x128xf32>
    %c0_12 = arith.constant 0 : index
    %c0_13 = arith.constant 0 : index
    %22 = vector.load %arg7[%c0_12, %c0_13] : memref<8x1xf32, #tpu.memory_space<vmem>>, vector<8x1xf32>
    %23 = vector.broadcast %22 : vector<8x1xf32> to vector<8x128xf32>
    %24 = arith.addf %21, %23 : vector<8x128xf32>
    %cst_14 = arith.constant 0.000000e+00 : f32
    %25 = vector.broadcast %cst_14 : f32 to vector<8x128xf32>
    %26 = arith.maximumf %24, %25 : vector<8x128xf32>
    %c0_15 = arith.constant 0 : index
    %c0_16 = arith.constant 0 : index
    %27 = vector.load %arg8[%c0_15, %c0_16] : memref<8x128xf32, #tpu.memory_space<vmem>>, vector<8x128xf32>
    tpu.vector_store %arg8[%c0_15, %c0_16], %26 {strides = array<i32>} : memref<8x128xf32, #tpu.memory_space<vmem>>, vector<8x128xf32>,
    return
  }
  func.func @transform_0(%arg0: i32) -> (i32, i32) {
    %c0_i32 = arith.constant 0 : i32
    %c0_i32_0 = arith.constant 0 : i32
    return %c0_i32, %arg0 : i32, i32
  }
  func.func @transform_1(%arg0: i32) -> (i32, i32) {
    %c1_i32 = arith.constant 1 : i32
    %0 = arith.muli %arg0, %c1_i32 : i32
    %c1_i32_0 = arith.constant 1 : i32
    %1 = arith.addi %0, %c1_i32_0 : i32
    %c0_i32 = arith.constant 0 : i32
    %c0_i32_1 = arith.constant 0 : i32
    return %c0_i32, %1 : i32, i32
  }
  func.func @transform_2(%arg0: i32) -> (i32, i32) {
    %c0_i32 = arith.constant 0 : i32
    %c0_i32_0 = arith.constant 0 : i32
    %c0_i32_1 = arith.constant 0 : i32
    return %c0_i32, %c0_i32_0 : i32, i32
  }
  func.func @transform_3(%arg0: i32) -> (i32, i32) {
    %c0_i32 = arith.constant 0 : i32
    %c0_i32_0 = arith.constant 0 : i32
    %c0_i32_1 = arith.constant 0 : i32
    return %c0_i32, %c0_i32_0 : i32, i32
  }
  func.func @transform_4(%arg0: i32) -> (i32, i32) {
    %c0_i32 = arith.constant 0 : i32
    %c0_i32_0 = arith.constant 0 : i32
    return %c0_i32, %arg0 : i32, i32
  }
  func.func @transform_5(%arg0: i32) -> (i32, i32) {
    %c0_i32 = arith.constant 0 : i32
    %c0_i32_0 = arith.constant 0 : i32
    %c0_i32_1 = arith.constant 0 : i32
    return %c0_i32, %c0_i32_0 : i32, i32
  }
  func.func @transform_6(%arg0: i32) -> (i32, i32) {
    %c0_i32 = arith.constant 0 : i32
    %c0_i32_0 = arith.constant 0 : i32
    %c0_i32_1 = arith.constant 0 : i32
    return %c0_i32, %c0_i32_0 : i32, i32
  }
  func.func @transform_7(%arg0: i32) -> (i32, i32) {
    %c0_i32 = arith.constant 0 : i32
    %c0_i32_0 = arith.constant 0 : i32
    return %c0_i32, %arg0 : i32, i32
  }
}

</mosaic_0001>

<bundles_post_ra>
// kernel: basic_block_forward.2
= control target key start
LH: loop header
LB: loop body
LE: loop exit
PB: predicated region body
PF: predicated region fallthrough
CT: control target
= control target key end

     0   :  { %s717_s15 = smov 0   ;;  %s811_s0 = inlined_call_operand.vmem [shape: bf16[4,896], index: 0, kind: input, shape index: {}, may-alias: {0,1}]   ;;  %s812_s1 = inlined_call_operand.vmem [shape: bf16[4,896], index: 1, kind: input, shape index: {}, may-alias: {0,1}]   ;;  %s813_s2 = inlined_call_operand.vmem [shape: bf16[8,36], index: 2, kind: input, shape index: {}]   ;;  %s814_s3 = inlined_call_operand.vmem [shape: f32[8,1], index: 3, kind: input, shape index: {}]   ;;  %s815_s4 = inlined_call_operand.vmem [shape: bf16[8,768], index: 4, kind: output, shape index: {}]  }
   0x1 LB: > { %s619_s16 = sadd.s32 4294967295, %s678_s15   ;;  %p623_p0 = scmp.ge.s32.totalorder %s678_s15, 1  ;;  %s678_s15 = sphi %s717_s15, %s14_s15  }
   0x2   : > { %p188_p1 = scmp.lt.s32.totalorder %s678_s15, 3 }
   0x4   : > { %p189_p2 = pnand %p623_p0, %p188_p1 }
   0x5   : > { %s725_s17 = smul.u32 (!%p189_p2), 3, %s619_s16  ;;  %v260_v0 = vlaneseq (!%p189_p2)  ;;  %v680_v1 = vmov (!%p189_p2), 1983009808   ;;  %s681_s28 = smov (!%p189_p2), 127   ;;  %v683_v18 = vmov (!%p189_p2), 0.0   ;;  %v689_v24 = vmov (!%p189_p2), 0  }
   0x6   : > { %192 = sbr.rel (%p189_p2) target bundleno = 422 (0x1a6), region = 36  ;;  %v258_v2 = vunpack.c.l.s4 (!%p189_p2), %v680_v1  ;;  %s682_s29 = smov (!%p189_p2), 126   ;;  %640 = vmatprep.subr.bf16.mxu1 (!%p189_p2), %v683_v18  ;;  %484 = vmatprep.mubr.bf16.mxu0 (!%p189_p2), %v689_v24  ;;  %vm690_vm0 = vmmov (!%p189_p2), 0   ;;  %v433_v25 = vld [vmem:[%s814_s3] sm:$0xff] (!%p189_p2)  ;;  %vm285_vm1 = vcmask (!%p189_p2), 1039360   ;;  %vm301_vm2 = vcmask (!%p189_p2), 1031168  }
   0x7   : > { %s239_s18 = sadd.s32 (!%p189_p2), 3, %s725_s17  ;;  %p229_p3 = scmp.lt.s32.totalorder (!%p189_p2), %s725_s17, 6  ;;  %v261_v3 = vshrl.u32 (!%p189_p2), %v260_v0, 7  ;;  %646 = vmatprep.mubr.msk.bf16.mxu1 (!%p189_p2), %vm690_vm0, %v683_v18  ;;  %670 = vset.pattern.permute.xlu0 (!%p189_p2), %v689_v24  ;;  %vm317_vm3 = vcmask (!%p189_p2), 900096   ;;  %vm381_vm4 = vcmask (!%p189_p2), 1041408   ;;  %vm398_vm5 = vcmask (!%p189_p2), 1045504  }
   0x8   : > { %p240_p4 = scmp.lt.s32.totalorder (!%p189_p2), %s239_s18, 6  ;;  %v259_v4 = vunpack.c.0.s8 (!%p189_p2), %v258_v2  ;;  %s684_s30 = smov (!%p189_p2), 110   ;;  %vm391_vm6 = vcmask (!%p189_p2), 1043456   ;;  %vm341_vm7 = vcmask (!%p189_p2), 883712   ;;  %vm353_vm8 = vcmask (!%p189_p2), 752640  }
   0x9   : > { %s685_s5 = smov (!%p189_p2), 109   ;;  %s686_s6 = smov (!%p189_p2), 108   ;;  %vm329_vm9 = vcmask (!%p189_p2), 891904   ;;  %vm365_vm10 = vcmask (!%p189_p2), 744448   ;;  %vm377_vm11 = vcmask (!%p189_p2), 736256   ;;  %vm439_vm12 = vcmask (!%p189_p2), 293888  }
   0xa   : > { %v262_v5 = vsub.s32 (!%p189_p2), %v259_v4, %v261_v3  ;;  %s687_s7 = smov (!%p189_p2), 92   ;;  %s688_s8 = smov (!%p189_p2), 91  }
   0xb   : > { %s691_s9 = smov (!%p189_p2), 90   ;;  %p247_p5 = scmp.lt.s32.totalorder (!%p189_p2), %s725_s17, 5 }
   0xd   : > { %s230_s19 = scalar_select %p229_p3, %s725_s17, 6 }
   0xe   : > { %s817_s18 = smov (!%p240_p4, %s239_s18), 6  ;;  %s819_s17 = smov (!%p247_p5, %s725_s17), 5 }
   0xf   : > { %s624_s20 = sshll.u32 %s230_s19, 1  ;;  %s625_s21 = sshll.u32 %s817_s18, 1 }
  0x10   : > { %s232_s24 = scalar_lea.vmem %s811_s0, %s624_s20  ;;  %s243_s27 = scalar_lea.vmem %s812_s1, %s625_s21 }
  0x11   : > { %v253_v6 = vld [vmem:[%s232_s24] sm:$0x3f]  ;;  %s626_s14 = sshll.u32 %s819_s17, 2 }
  0x12   : > { %v254_v7 = vld [vmem:[%s243_s27] sm:$0x3]  ;;  %v736_v8 = vrot.slane %v253_v6, %v262_v5  ;;  %v256_v9 = vcombine.high %v253_v6, %v253_v6  ;;  %s250_s19 = scalar_lea.vmem %s815_s4, %s626_s14 }
  0x13   : > { %v276_v10 = vrot.slane %v254_v7, 6  ;;  %v292_v20 = vrot.slane %v254_v7, 4  ;;  %v308_v22 = vrot.slane %v254_v7, 2 }
  0x14   : > { %v289_v11 = vrot.slane %v736_v8, 4  ;;  %v741_v12 = vcombine.high %v736_v8, %v736_v8  ;;  %v273_v13 = vrot.slane %v736_v8, 6  ;;  %v745_v15 = vrot.slane %v256_v9, %v262_v5 }
  0x15   : > { %283 = vrot.lane.b32.xlu1 %v276_v10, %s681_s28  ;;  %v305_v23 = vrot.slane %v736_v8, 2 }
  0x16   : > { %293 = vrot.lane.b32.xlu0 %v289_v11, %s682_s29  ;;  %v274_v14 = vrot.slane %v741_v12, 6  ;;  %v275_v16 = vrot.slane %v745_v15, 6  ;;  %v306_v17 = vrot.slane %v741_v12, 2  ;;  %v291_v19 = vrot.slane %v745_v15, 4 }
  0x17   : > { %v307_v21 = vrot.slane %v745_v15, 2 }
  0x19   : > { %277 = vrot.lane.b32.xlu1 %v273_v13, %s681_s28 }
  0x1a   : > { %279 = vrot.lane.b32.xlu0 %v274_v14, %s681_s28 }
  0x1d   : > { %295 = vrot.lane.b32.xlu1 %v741_v12, %s682_s29 }
  0x1e   : > { %281 = vrot.lane.b32.xlu0 %v275_v16, %s681_s28 }
  0x21   : > { %311 = vrot.lane.b32.xlu1 %v306_v17, %s684_s30 }
  0x22   : > { %297 = vrot.lane.b32.xlu0 %v291_v19, %s682_s29 }
  0x25   : > { %299 = vrot.lane.b32.xlu1 %v292_v20, %s682_s29 }
  0x26   : > { %313 = vrot.lane.b32.xlu0 %v307_v21, %s684_s30 }
  0x29   : > { %315 = vrot.lane.b32.xlu1 %v308_v22, %s684_s30 }
  0x2a   : > { %309 = vrot.lane.b32.xlu0 %v305_v23, %s684_s30 }
  0x2d   : > { %325 = vrot.lane.b32.xlu1 %v745_v15, %s685_s5 }
  0x2e   : > { %323 = vrot.lane.b32.xlu0 %v741_v12, %s685_s5 }
  0x31   : > { %337 = vrot.lane.b32.xlu1 %v275_v16, %s686_s6 }
  0x32   : > { %335 = vrot.lane.b32.xlu0 %v274_v14, %s686_s6 }
  0x35   : > { %333 = vrot.lane.b32.xlu1 %v273_v13, %s686_s6 }
  0x36   : > { %321 = vrot.lane.b32.xlu0 %v736_v8, %s685_s5 }
  0x39   : > { %349 = vrot.lane.b32.xlu1 %v291_v19, %s687_s7 }
  0x3a   : > { %347 = vrot.lane.b32.xlu0 %v741_v12, %s687_s7 }
  0x3d   : > { %339 = vrot.lane.b32.xlu1 %v276_v10, %s686_s6 }
  0x3e   : > { %327 = vrot.lane.b32.xlu0 %v254_v7, %s685_s5 }
  0x41   : > { %359 = vrot.lane.b32.xlu1 %v306_v17, %s688_s8 }
  0x42   : > { %345 = vrot.lane.b32.xlu0 %v289_v11, %s687_s7 }
  0x45   : > { %351 = vrot.lane.b32.xlu1 %v292_v20, %s687_s7 }
  0x46   : > { %361 = vrot.lane.b32.xlu0 %v307_v21, %s688_s8 }
  0x49   : > { %363 = vrot.lane.b32.xlu1 %v308_v22, %s688_s8 }
  0x4a   : > { %357 = vrot.lane.b32.xlu0 %v305_v23, %s688_s8 }
  0x4d   : > { %371 = vrot.lane.b32.xlu1 %v741_v12, %s691_s9 }
  0x4e   : > { %369 = vrot.lane.b32.xlu0 %v736_v8, %s691_s9 }
  0x51   : > { %375 = vrot.lane.b32.xlu1 %v254_v7, %s691_s9 }
  0x52   : > { %373 = vrot.lane.b32.xlu0 %v745_v15, %s691_s9 }
  0x56   : > { %436 = vperm.xlu0 %670, %v433_v25  }
  0x87   : > { %v284_v26 = vpop.permute.xlu1 %283 }
  0x88   : > { %v294_v27 = vpop.permute.xlu0 %293 }
  0x8b   : > { %v278_v28 = vpop.permute.xlu1 %277 }
  0x8c   : > { %v280_v29 = vpop.permute.xlu0 %279 }
  0x8d   : > { %v286_v40 = vsel %vm285_vm1, %v278_v28, %v280_v29 }
  0x8e   : > { %v384_v48 = vsel %vm381_vm4, %v736_v8, %v286_v40 }
  0x8f   : > { %v296_v30 = vpop.permute.xlu1 %295 }
  0x90   : > { %v282_v31 = vpop.permute.xlu0 %281  ;;  %v302_v44 = vsel %vm301_vm2, %v294_v27, %v296_v30 }
  0x91   : > { %v287_v34 = vsel %vm285_vm1, %v280_v29, %v282_v31  ;;  %v288_v37 = vsel %vm285_vm1, %v282_v31, %v284_v26  ;;  %v393_v54 = vsel %vm391_vm6, %v384_v48, %v302_v44 }
  0x92   : > { %v387_v38 = vsel %vm381_vm4, %v741_v12, %v287_v34  ;;  %v390_v46 = vsel %vm381_vm4, %v745_v15, %v288_v37 }
  0x93   : > { %v312_v32 = vpop.permute.xlu1 %311 }
  0x94   : > { %v298_v33 = vpop.permute.xlu0 %297 }
  0x95   : > { %v303_v35 = vsel %vm301_vm2, %v296_v30, %v298_v33 }
  0x96   : > { %v395_v43 = vsel %vm391_vm6, %v387_v38, %v303_v35 }
  0x97   : > { %v300_v36 = vpop.permute.xlu1 %299 }
  0x98   : > { %v314_v39 = vpop.permute.xlu0 %313  ;;  %v304_v41 = vsel %vm301_vm2, %v298_v33, %v300_v36 }
  0x99   : > { %v319_v42 = vsel %vm317_vm3, %v312_v32, %v314_v39  ;;  %v397_v51 = vsel %vm391_vm6, %v390_v46, %v304_v41 }
  0x9a   : > { %v403_v45 = vsel %vm398_vm5, %v395_v43, %v319_v42 }
  0x9b   : > { %v316_v47 = vpop.permute.xlu1 %315  ;;  %452 = vmatprep.subr.bf16.mxu0 %v403_v45 }
  0x9c   : > { %v320_v49 = vsel %vm317_vm3, %v314_v39, %v316_v47  ;;  %v310_v50 = vpop.permute.xlu0 %309 }
  0x9d   : > { %v318_v52 = vsel %vm317_vm3, %v310_v50, %v312_v32  ;;  %v406_v53 = vsel %vm398_vm5, %v397_v51, %v320_v49 }
  0x9e   : > { %641 = vmatpush3.bf16.msra.mxu1 %v406_v53  ;;  %v400_v55 = vsel %vm398_vm5, %v393_v54, %v318_v52 }
  0x9f   : > { %v326_v56 = vpop.permute.xlu1 %325  ;;  %453 = vmatpush1.bf16.msra.mxu0 %v400_v55  ;;  %642 = vmatprep.subr.bf16.mxu1 %v683_v18 }
  0xa0   : > { %v324_v57 = vpop.permute.xlu0 %323 }
  0xa1   : > { %v331_v6 = vsel %vm329_vm9, %v324_v57, %v326_v56 }
  0xa3   : > { %v338_v58 = vpop.permute.xlu1 %337 }
  0xa4   : > { %v336_v59 = vpop.permute.xlu0 %335 }
  0xa5   : > { %v343_v4 = vsel %vm341_vm7, %v336_v59, %v338_v58 }
  0xa6   : > { %v413_v8 = vsel %vm381_vm4, %v331_v6, %v343_v4 }
  0xa7   : > { %v334_v60 = vpop.permute.xlu1 %333 }
  0xa8   : > { %v322_v61 = vpop.permute.xlu0 %321  ;;  %v342_v9 = vsel %vm341_vm7, %v334_v60, %v336_v59 }
  0xa9   : > { %v330_v13 = vsel %vm329_vm9, %v322_v61, %v324_v57 }
  0xaa   : > { %v410_v22 = vsel %vm381_vm4, %v330_v13, %v342_v9 }
  0xab   : > { %v350_v62 = vpop.permute.xlu1 %349 }
  0xac   : > { %v348_v63 = vpop.permute.xlu0 %347 }
  0xad   : > { %v355_v5 = vsel %vm353_vm8, %v348_v63, %v350_v62 }
  0xae   : > { %v420_v16 = vsel %vm391_vm6, %v413_v8, %v355_v5 }
  0xaf   : > { %v340_v0 = vpop.permute.xlu1 %339 }
  0xb0   : > { %v328_v1 = vpop.permute.xlu0 %327  ;;  %v344_v10 = vsel %vm341_vm7, %v338_v58, %v340_v0 }
  0xb1   : > { %v332_v11 = vsel %vm329_vm9, %v326_v56, %v328_v1 }
  0xb2   : > { %v416_v20 = vsel %vm381_vm4, %v332_v11, %v344_v10 }
  0xb3   : > { %v360_v2 = vpop.permute.xlu1 %359 }
  0xb4   : > { %v346_v3 = vpop.permute.xlu0 %345 }
  0xb5   : > { %v354_v17 = vsel %vm353_vm8, %v346_v3, %v348_v63 }
  0xb6   : > { %v418_v28 = vsel %vm391_vm6, %v410_v22, %v354_v17 }
  0xb7   : > { %v352_v7 = vpop.permute.xlu1 %351 }
  0xb8   : > { %v362_v12 = vpop.permute.xlu0 %361  ;;  %v356_v14 = vsel %vm353_vm8, %v350_v62, %v352_v7 }
  0xb9   : > { %v367_v15 = vsel %vm365_vm10, %v360_v2, %v362_v12  ;;  %v422_v25 = vsel %vm391_vm6, %v416_v20, %v356_v14 }
  0xba   : > { %v427_v19 = vsel %vm398_vm5, %v420_v16, %v367_v15 }
  0xbb   : > { %v364_v21 = vpop.permute.xlu1 %363  ;;  %454 = vmatprep.subr.bf16.mxu0 %v427_v19 }
  0xbc   : > { %v368_v23 = vsel %vm365_vm10, %v362_v12, %v364_v21  ;;  %v358_v24 = vpop.permute.xlu0 %357 }
  0xbd   : > { %v366_v26 = vsel %vm365_vm10, %v358_v24, %v360_v2  ;;  %v430_v27 = vsel %vm398_vm5, %v422_v25, %v368_v23 }
  0xbe   : > { %643 = vmatpush3.bf16.msra.mxu1 %v430_v27  ;;  %v424_v29 = vsel %vm398_vm5, %v418_v28, %v366_v26 }
  0xbf   : > { %455 = vmatpush1.bf16.msra.mxu0 %v424_v29  ;;  %v372_v30 = vpop.permute.xlu1 %371  ;;  %644 = vmatprep.subr.bf16.mxu1 %v683_v18  ;;  %v432_v18 = vld [vmem:[%s813_s2] sm:$0xf] }
  0xc0   : > { %v370_v31 = vpop.permute.xlu0 %369 }
  0xc1   : > { %v378_v32 = vsel %vm377_vm11, %v370_v31, %v372_v30 }
  0xc2   : > { %v444_v37 = vsel %vm381_vm4, %v378_v32, 0 }
  0xc3   : > { %v376_v33 = vpop.permute.xlu1 %375 }
  0xc4   : > { %v374_v34 = vpop.permute.xlu0 %373 }
  0xc5   : > { %v379_v35 = vsel %vm377_vm11, %v372_v30, %v374_v34  ;;  %v380_v36 = vsel %vm377_vm11, %v374_v34, %v376_v33 }
  0xc6   : > { %627 = vmatprep.subr.msk.bf16.mxu0 %vm381_vm4, %v379_v35  ;;  %v450_v38 = vsel %vm381_vm4, %v380_v36, 0 }
  0xc7   : > { %457 = vmatpush1.bf16.msra.mxu0 %v444_v37  ;;  %645 = vmatpush3.bf16.msra.mxu1 %v450_v38 }
  0xca   : > { %628 = vmatmul.mubr.msk.bf16.vlgmr.msra.gmra.mrb[0].mxu0 %vm439_vm12, %v432_v18  ;;  %647 = vmatmul.mubr.msk.bf16.vlgmr.msra.gmra.mrb[0].mxu1 %vm439_vm12, %v432_v18 }
  0xd5   : > { %v437_v39 = vpop.permute.xlu0 %436 }
 0x19d   : > { %v486_v40 = vpop.f32.mrb[0].mxu0  ;;  %v527_v41 = vpop.f32.mrb[0].mxu1 }
 0x19e   : > { %v487_v42 = vadd.f32 %v486_v40, %v437_v39  ;;  %v528_v43 = vadd.f32 %v527_v41, %v437_v39  ;;  %v488_v44 = vpop.f32.mrb[1].mxu0  ;;  %v648_v45 = vpop.f32.mrb[1].mxu1 }
 0x19f   : > { %v489_v46 = vadd.f32 %v488_v44, %v437_v39  ;;  %v490_v47 = vpop.f32.mrb[2].mxu0  ;;  %v530_v48 = vpop.f32.mrb[2].mxu1 }
 0x1a0   : > { %v533_v49 = vmax.f32 %v487_v42, 0.0  ;;  %v535_v50 = vmax.f32 %v528_v43, 0.0  ;;  %v491_v51 = vpop.f32.mrb[3].mxu0  ;;  %v649_v52 = vpop.f32.mrb[3].mxu1 }
 0x1a1   : > { %v534_v53 = vmax.f32 %v489_v46, 0.0 }
 0x1a2   : > { %v635_v54 = vpack.c.bf16 %v535_v50, %v535_v50 }
 0x1a3   : > { %v634_v55 = vpack.c.bf16 %v534_v53, %v533_v49 }
 0x1a4   : > { %550 = vst [vmem:[%s250_s19 + $0x8] sm:$0xf] %v635_v54 }
 0x1a5   : > { %549 = vst [vmem:[%s250_s19] sm:$0xff] %v634_v55 }
 0x1a6 PF: > { %s14_s15 = sadd.s32 1, %s678_s15  }
 0x1a7   : > { %p11_p6 = scmp.ge.s32.totalorder %s14_s15, 4  }
 0x1a9   :  { %13 = sbr.rel (!%p11_p6) target bundleno = 1 (0x1), region = 69 }

// kernel: basic_block_forward.3
= control target key start
LH: loop header
LB: loop body
LE: loop exit
PB: predicated region body
PF: predicated region fallthrough
CT: control target
= control target key end

     0   :  { %s699_s24 = smov 0   ;;  %s766_s0 = inlined_call_operand.vmem [shape: bf16[8,384], index: 0, kind: input, shape index: {}, may-alias: {0,1}]   ;;  %s767_s1 = inlined_call_operand.vmem [shape: bf16[8,384], index: 1, kind: input, shape index: {}, may-alias: {0,1}]   ;;  %s768_s2 = inlined_call_operand.vmem [shape: bf16[8,72], index: 2, kind: input, shape index: {}]   ;;  %s769_s3 = inlined_call_operand.vmem [shape: f32[8,1], index: 3, kind: input, shape index: {}]   ;;  %s770_s4 = inlined_call_operand.vmem [shape: bf16[4,256], index: 4, kind: input, shape index: {}]   ;;  %s771_s5 = inlined_call_operand.vmem [shape: bf16[8,4], index: 5, kind: input, shape index: {}]   ;;  %s772_s6 = inlined_call_operand.vmem [shape: f32[8,1], index: 6, kind: input, shape index: {}]   ;;  %s773_s7 = inlined_call_operand.vmem [shape: f32[8,256], index: 7, kind: output, shape index: {}]  }
   0x1 LB: > { %s705_s25 = sadd.s32 4294967295, %s646_s24   ;;  %p582_p0 = scmp.ge.s32.totalorder %s646_s24, 1  ;;  %s646_s24 = sphi %s699_s24, %s17_s24  }
   0x2   : > { %p258_p1 = scmp.lt.s32.totalorder %s646_s24, 3 }
   0x4   : > { %p259_p2 = pnand %p582_p0, %p258_p1 }
   0x5   : > { %p297_p3 = scmp.lt.s32.totalorder (!%p259_p2), %s705_s25, 2  ;;  %s301_s26 = sadd.s32 (!%p259_p2), 1, %s705_s25  ;;  %v648_v0 = vmov (!%p259_p2), 0.0   ;;  %vm447_vm0 = vcmask (!%p259_p2), 1041408   ;;  %v441_v7 = vld [vmem:[%s771_s5] sm:$0xf] (!%p259_p2) }
   0x6   : > { %262 = sbr.rel (%p259_p2) target bundleno = 389 (0x185), region = 48  ;;  %p302_p4 = scmp.lt.s32.totalorder (!%p259_p2), %s301_s26, 2  ;;  %599 = vmatprep.subr.bf16.mxu0 (!%p259_p2), %v648_v0  ;;  %613 = vmatprep.subr.bf16.mxu1 (!%p259_p2), %v648_v0  ;;  %vm443_vm1 = vcmask (!%p259_p2), 31744   ;;  %vm655_vm2 = vmmov (!%p259_p2), 0   ;;  %v656_v8 = vmov (!%p259_p2), 0   ;;  %v492_v9 = vld [vmem:[%s772_s6] sm:$0xff] (!%p259_p2) }
   0x7   : > { %s649_s9 = smov (!%p259_p2), 126   ;;  %s650_s11 = smov (!%p259_p2), 127   ;;  %615 = vmatprep.mubr.msk.bf16.mxu1 (!%p259_p2), %vm655_vm2, %v648_v0  ;;  %609 = vmatprep.mubr.msk.bf16.mxu0 (!%p259_p2), %vm655_vm2, %v648_v0  ;;  %v388_v10 = vld [vmem:[%s769_s3] sm:$0xff] (!%p259_p2)  ;;  %vm326_vm3 = vcmask (!%p259_p2), 1039360   ;;  %vm338_vm4 = vcmask (!%p259_p2), 965632   ;;  %vm370_vm5 = vcmask (!%p259_p2), 1043456  }
   0x8   : > { %s651_s15 = smov (!%p259_p2), 118   ;;  %p307_p5 = scmp.lt.s32.totalorder (!%p259_p2), %s705_s25, 1  ;;  %638 = vset.pattern.permute.xlu0 (!%p259_p2), %v656_v8  ;;  %639 = vset.pattern.permute.xlu1 (!%p259_p2), %v656_v8  ;;  %vm332_vm6 = vcmask (!%p259_p2), 1031168   ;;  %vm344_vm7 = vcmask (!%p259_p2), 957440   ;;  %vm350_vm8 = vcmask (!%p259_p2), 949248   ;;  %vm356_vm9 = vcmask (!%p259_p2), 883712  }
   0x9   : > { %s652_s16 = smov (!%p259_p2), 117   ;;  %s653_s21 = smov (!%p259_p2), 116   ;;  %vm362_vm10 = vcmask (!%p259_p2), 875520   ;;  %vm368_vm11 = vcmask (!%p259_p2), 867328   ;;  %v387_v40 = vld [vmem:[%s768_s2] sm:$0xf] (!%p259_p2) }
   0xa   : > { %vm394_vm12 = vcmask (!%p259_p2), 588800  }
   0xd   : > { %s298_s27 = scalar_select %p297_p3, %s705_s25, 2 }
   0xe   : > { %s775_s26 = smov (!%p302_p4, %s301_s26), 2  ;;  %s777_s25 = smov (!%p307_p5, %s705_s25), 1 }
   0xf   : > { %s583_s28 = sshll.u32 %s298_s27, 2  ;;  %s584_s10 = sshll.u32 %s775_s26, 2 }
  0x10   : > { %s300_s8 = scalar_lea.vmem %s766_s0, %s583_s28  ;;  %s305_s14 = scalar_lea.vmem %s767_s1, %s584_s10 }
  0x11   : > { %v717_v1 = vld [vmem:[%s300_s8] sm:$0xf]  ;;  %s585_s17 = sshll.u32 %s777_s25, 1  ;;  %s654_s26 = smov 108  }
  0x12   : > { %328 = vrot.lane.b32.xlu1 %v717_v1, %s649_s9  ;;  %v320_v2 = vrot.slane %v717_v1, 4  ;;  %v317_v3 = vld [vmem:[%s305_s14] sm:$0xf]  ;;  %s310_s20 = scalar_lea.vmem %s770_s4, %s585_s17  ;;  %s657_s27 = smov 107  }
  0x13   : > { %v321_v4 = vrot.slane %v317_v3, 4  ;;  %v442_v5 = vld [vmem:[%s310_s20] sm:$0x3]  ;;  %s658_s28 = smov 106   ;;  %s586_s12 = sshll.u32 %s777_s25, 3 }
  0x14   : > { %322 = vrot.lane.b32.xlu0 %v320_v2, %s650_s11  ;;  %v449_v6 = vsel %vm447_vm0, %v442_v5, 0 }
  0x15   : > { %614 = vmatpush3.bf16.msra.mxu1 %v449_v6 }
  0x16   : > { %330 = vrot.lane.b32.xlu1 %v317_v3, %s649_s9 }
  0x18   : > { %334 = vrot.lane.b32.xlu0 %v320_v2, %s651_s15  ;;  %616 = vmatmul.mubr.msk.bf16.vlgmr.msra.gmra.mrb[0].mxu1 %vm443_vm1, %v441_v7 }
  0x1a   : > { %336 = vrot.lane.b32.xlu1 %v321_v4, %s651_s15  ;;  %s314_s15 = scalar_lea.vmem %s773_s7, %s586_s12 }
  0x1c   : > { %324 = vrot.lane.b32.xlu0 %v321_v4, %s650_s11 }
  0x1e   : > { %342 = vrot.lane.b32.xlu1 %v317_v3, %s652_s16 }
  0x20   : > { %340 = vrot.lane.b32.xlu0 %v717_v1, %s652_s16 }
  0x22   : > { %348 = vrot.lane.b32.xlu1 %v321_v4, %s653_s21 }
  0x24   : > { %346 = vrot.lane.b32.xlu0 %v320_v2, %s653_s21 }
  0x26   : > { %354 = vrot.lane.b32.xlu1 %v317_v3, %s654_s26 }
  0x28   : > { %352 = vrot.lane.b32.xlu0 %v717_v1, %s654_s26 }
  0x2a   : > { %360 = vrot.lane.b32.xlu1 %v321_v4, %s657_s27 }
  0x2c   : > { %358 = vrot.lane.b32.xlu0 %v320_v2, %s657_s27 }
  0x2e   : > { %366 = vrot.lane.b32.xlu1 %v317_v3, %s658_s28 }
  0x30   : > { %364 = vrot.lane.b32.xlu0 %v717_v1, %s658_s28 }
  0x32   : > { %495 = vperm.xlu1 %639, %v492_v9  }
  0x34   : > { %391 = vperm.xlu0 %638, %v388_v10  }
  0x84   : > { %v329_v11 = vpop.permute.xlu1 %328 }
  0x86   : > { %v323_v12 = vpop.permute.xlu0 %322 }
  0x88   : > { %v331_v13 = vpop.permute.xlu1 %330 }
  0x89   : > { %v333_v22 = vsel %vm332_vm6, %v329_v11, %v331_v13 }
  0x8a   : > { %v335_v14 = vpop.permute.xlu0 %334 }
  0x8c   : > { %v337_v15 = vpop.permute.xlu1 %336 }
  0x8d   : > { %v339_v20 = vsel %vm338_vm4, %v335_v14, %v337_v15 }
  0x8e   : > { %v325_v16 = vpop.permute.xlu0 %324  ;;  %v377_v23 = vsel %vm370_vm5, %v333_v22, %v339_v20 }
  0x8f   : > { %v327_v17 = vsel %vm326_vm3, %v323_v12, %v325_v16 }
  0x90   : > { %v373_v18 = vsel %vm370_vm5, %v717_v1, %v327_v17  ;;  %v343_v19 = vpop.permute.xlu1 %342 }
  0x91   : > { %600 = vmatpush3.bf16.msra.mxu0 %v373_v18 }
  0x92   : > { %v341_v21 = vpop.permute.xlu0 %340  ;;  %601 = vmatprep.subr.bf16.mxu0 %v648_v0 }
  0x93   : > { %v345_v26 = vsel %vm344_vm7, %v341_v21, %v343_v19 }
  0x94   : > { %v349_v24 = vpop.permute.xlu1 %348 }
  0x95   : > { %602 = vmatpush3.bf16.msra.mxu0 %v377_v23 }
  0x96   : > { %v347_v25 = vpop.permute.xlu0 %346  ;;  %603 = vmatprep.subr.bf16.mxu0 %v648_v0 }
  0x97   : > { %v351_v27 = vsel %vm350_vm8, %v347_v25, %v349_v24 }
  0x98   : > { %v381_v28 = vsel %vm370_vm5, %v345_v26, %v351_v27  ;;  %v355_v29 = vpop.permute.xlu1 %354 }
  0x99   : > { %604 = vmatpush3.bf16.msra.mxu0 %v381_v28 }
  0x9a   : > { %v353_v30 = vpop.permute.xlu0 %352  ;;  %605 = vmatprep.subr.bf16.mxu0 %v648_v0 }
  0x9b   : > { %v357_v33 = vsel %vm356_vm9, %v353_v30, %v355_v29 }
  0x9c   : > { %v361_v31 = vpop.permute.xlu1 %360 }
  0x9e   : > { %v359_v32 = vpop.permute.xlu0 %358 }
  0x9f   : > { %v363_v34 = vsel %vm362_vm10, %v359_v32, %v361_v31 }
  0xa0   : > { %v385_v35 = vsel %vm370_vm5, %v357_v33, %v363_v34  ;;  %v367_v36 = vpop.permute.xlu1 %366 }
  0xa1   : > { %606 = vmatpush3.bf16.msra.mxu0 %v385_v35 }
  0xa2   : > { %v365_v37 = vpop.permute.xlu0 %364  ;;  %607 = vmatprep.subr.bf16.mxu0 %v648_v0 }
  0xa3   : > { %v369_v38 = vsel %vm368_vm11, %v365_v37, %v367_v36 }
  0xa4   : > { %v399_v39 = vsel %vm370_vm5, %v369_v38, 0 }
  0xa5   : > { %608 = vmatpush3.bf16.msra.mxu0 %v399_v39 }
  0xa8   : > { %610 = vmatmul.mubr.msk.bf16.vlgmr.msra.gmra.mrb[0].mxu0 %vm394_vm12, %v387_v40 }
  0xb1   : > { %v496_v50 = vpop.permute.xlu1 %495 }
  0xb3   : > { %v392_v45 = vpop.permute.xlu0 %391 }
  0xeb   : > { %v485_v41 = vpop.f32.mrb[0].mxu1 }
  0xec   : > { %v617_v42 = vpop.f32.mrb[1].mxu1 }
  0xed   : > { %v488_v43 = vpop.f32.mrb[2].mxu1 }
  0xee   : > { %v618_v44 = vpop.f32.mrb[3].mxu1 }
 0x17b   : > { %v435_v46 = vpop.f32.mrb[0].mxu0 }
 0x17c   : > { %v436_v47 = vadd.f32 %v435_v46, %v392_v45  ;;  %v611_v48 = vpop.f32.mrb[1].mxu0 }
 0x17d   : > { %v438_v49 = vpop.f32.mrb[2].mxu0 }
 0x17e   : > { %v612_v51 = vpop.f32.mrb[3].mxu0  ;;  %v491_v52 = vadd.f32 %v485_v41, %v436_v47 }
 0x180   : > { %v498_v53 = vadd.f32 %v496_v50, %v491_v52 }
 0x182   : > { %v499_v54 = vmax.f32 %v498_v53, 0.0 }
 0x184   : > { %500 = vst [vmem:[%s314_s15] sm:$0xff] %v499_v54 }
 0x185 PF: > { %s17_s24 = sadd.s32 1, %s646_s24  }
 0x186   : > { %p14_p6 = scmp.ge.s32.totalorder %s17_s24, 4  }
 0x188   :  { %16 = sbr.rel (!%p14_p6) target bundleno = 1 (0x1), region = 84 }

</bundles_post_ra>
